<compile_context>
chip_gen: v7x
topology: tpu7x:2x2x1
jax: 0.10.0
libtpu: 0.0.40
codegen_flags: <defaults>
</compile_context>

<pallas_src>
import functools

import jax
import jax.numpy as jnp
from jax.experimental import pallas as pl
from jax.experimental.pallas import tpu as pltpu

KL_WEIGHT = 0.01    # stand-in for settings.kl_weight (external config in torch code)
GUMBEL_TAU = 1.0    # default gumbel-softmax temperature
EPS = 1e-6
LANES = 128
NEG_PAD = -1e9      # baked into padded lanes of b_c; exp underflows to exactly 0


def _round_up(n, m):
    return ((n + m - 1) // m) * m


def vq2_kernel(xg_ref, wq_ref, pf_ref, out_ref, loss_ref, *,
               n, num_protos, r_g, r_wc, r_pq, tau, kl_weight):
    P = num_protos

    x = xg_ref[0:n, :]                 # (N, 128) f32; x in lanes [:input_dim], rest 0
    g = xg_ref[r_g:r_g + n, :]         # (N, 128) f32; gumbel in lanes [:P], rest 0

    head = pf_ref[0:8, :]              # biases + folded distance bias
    b_emb, b1, b2, b_c = head[0:1], head[1:2], head[2:3], head[3:4]

    def mm_bf16(a, r0):
        # bf16 MXU operands, f32 accumulation; weight blocks are (128, 128) so the
        # full lane-dense activation is consumed (padded lanes are exactly 0).
        return jnp.dot(a.astype(jnp.bfloat16), wq_ref[r0:r0 + LANES, :],
                       preferred_element_type=jnp.float32)

    # feature embedder (no activation), then 2 ReLU MLP layers.
    h = mm_bf16(x, 0) + b_emb                              # (N, 128)
    h = jnp.maximum(mm_bf16(h, LANES) + b1, 0.0)           # (N, 128)
    h = jnp.maximum(mm_bf16(h, 2 * LANES) + b2, 0.0)       # (N, 128)

    # fused fc_mu + prototype distances (f32 operands):
    #   neg_dists = 2*mu@protos^T - ||protos||^2  (||mu||^2 dropped: row constant)
    # padded lanes (>= P) carry NEG_PAD from b_c.
    w_c = pf_ref[r_wc:r_wc + LANES, :]                     # (128, 128) f32
    neg_dists = jnp.dot(h, w_c, preferred_element_type=jnp.float32) + b_c   # (N, 128)

    # logprobs = log_softmax(neg_dists) over the P real lanes (padded lanes -> exp 0)
    m = jnp.max(neg_dists, axis=1, keepdims=True)
    z = neg_dists - m
    exp_z = jnp.exp(z)
    sumexp = jnp.sum(exp_z, axis=1, keepdims=True)
    logprobs = z - jnp.log(sumexp)
    probs = exp_z / sumexp                                 # reuse exp_z (no 2nd exp)

    # hard gumbel-softmax sample: one-hot of argmax((logits + g)/tau),
    # torch-style first-max tie breaking. Padded lanes (~-1e9) never win.
    perturbed = (neg_dists + g) * (1.0 / tau)
    pmax = jnp.max(perturbed, axis=1, keepdims=True)
    lane = jax.lax.broadcasted_iota(jnp.int32, perturbed.shape, 1)
    first_max = jnp.min(jnp.where(perturbed >= pmax, lane, LANES),
                        axis=1, keepdims=True)
    onehot = (lane == first_max).astype(jnp.float32)       # (N, 128), hot lane < P

    # quantized latents = onehot @ prototypes, lane-dense (N, 128) slab
    protos_q = pf_ref[r_pq:r_pq + LANES, :]                # (128, 128) f32
    out_ref[...] = jnp.dot(onehot, protos_q, preferred_element_type=jnp.float32)

    # VQ loss: kl_weight * KLDiv(batchmean)(logprobs, prior) + 0.01 * entropy(prior)
    # Reductions are masked to the P real proto lanes.
    prior = jnp.mean(probs + EPS, axis=0, keepdims=True)   # (1, 128)
    log_prior = jnp.log(prior)
    sum_lp = jnp.sum(logprobs, axis=0, keepdims=True)      # (1, 128)
    lane1 = jax.lax.broadcasted_iota(jnp.int32, (1, LANES), 1)
    valid = lane1 < P
    capacity = jnp.sum(jnp.where(valid, prior * (log_prior - sum_lp * (1.0 / n)), 0.0))
    ent = jnp.sum(jnp.where(valid, -prior * log_prior, 0.0))
    loss_ref[0, 0] = kl_weight * capacity + 0.01 * ent


def pack_params(params):
    """Packs parameters into two lane-dense buffers + a static layout dict."""
    w_emb, b_emb = params["w_emb"], params["b_emb"]
    w1, b1 = params["w1"], params["b1"]
    w2, b2 = params["w2"], params["b2"]
    w_mu, b_mu = params["w_mu"], params["b_mu"]
    protos = params["protos"]                              # (P, D) f32

    input_dim, hidden_dim = w_emb.shape
    comm_dim = w2.shape[1]
    latent_dim = w_mu.shape[1]
    num_protos, proto_dim = protos.shape
    assert proto_dim == latent_dim
    # TODO(synk): fused kernel assumes num_simultaneous_tokens == 1 and num_imgs == 1
    # (the torch reshapes are then identities).
    assert latent_dim == comm_dim
    for d in (input_dim, hidden_dim, comm_dim, latent_dim, num_protos):
        assert d <= LANES, "packed layout assumes every feature dim <= 128"

    def pad128(a, dtype):
        a = jnp.asarray(a, dtype)
        r, c = a.shape
        return jnp.pad(a, ((0, LANES - r), (0, LANES - c)))

    # bf16 weight buffer: every block (128, 128) so no in-kernel lane slices.
    wq = jnp.concatenate([pad128(w_emb, jnp.bfloat16),
                          pad128(w1, jnp.bfloat16),
                          pad128(w2, jnp.bfloat16)], axis=0)          # (384, 128) bf16

    # fold fc_mu into the prototype-distance matmul (done once, in f32).
    protos_f32 = jnp.asarray(protos, jnp.float32)
    w_mu_f32 = jnp.asarray(w_mu, jnp.float32)
    b_mu_f32 = jnp.asarray(b_mu, jnp.float32)
    w_c = 2.0 * (w_mu_f32 @ protos_f32.T)                             # (D, P)
    b_c = (2.0 * (b_mu_f32 @ protos_f32.T)
           - jnp.sum(protos_f32 * protos_f32, axis=1)[None, :])       # (1, P)

    # f32 buffer: [biases + b_c | W_c | protos], each block 8-row aligned.
    head = jnp.zeros((8, LANES), jnp.float32)
    head = head.at[0, :hidden_dim].set(jnp.asarray(b_emb, jnp.float32)[0])
    head = head.at[1, :hidden_dim].set(jnp.asarray(b1, jnp.float32)[0])
    head = head.at[2, :comm_dim].set(jnp.asarray(b2, jnp.float32)[0])
    head = head.at[3, :].set(NEG_PAD)                                 # pad lanes of b_c
    head = head.at[3, :num_protos].set(b_c[0])
    pf = jnp.concatenate([head,
                          pad128(w_c, jnp.float32),
                          pad128(protos_f32, jnp.float32)], axis=0)   # (264, 128) f32

    layout = dict(input_dim=input_dim, comm_dim=comm_dim, num_protos=num_protos,
                  r_wc=8, r_pq=8 + LANES)
    return wq, pf, layout


def vq2_forward(x, gumbel_noise, wq, pf, layout):
    """Runs the fused VQ2 forward. Returns (output, total_loss, capacity)."""
    n, input_dim = x.shape                 # num_simultaneous_tokens == 1 -> N == batch
    assert input_dim == layout["input_dim"]
    comm_dim = layout["comm_dim"]
    P = layout["num_protos"]
    n_pad = _round_up(n, 8)

    # pack x and gumbel noise into one lane-dense buffer -> 3 input DMAs total.
    x_pad = jnp.pad(jnp.asarray(x, jnp.float32),
                    ((0, n_pad - n), (0, LANES - input_dim)))
    g_pad = jnp.pad(jnp.asarray(gumbel_noise, jnp.float32),
                    ((0, n_pad - n), (0, LANES - P)))
    xg = jnp.concatenate([x_pad, g_pad], axis=0)           # (2*n_pad, 128) f32

    kernel = functools.partial(
        vq2_kernel, n=n, num_protos=P, r_g=n_pad,
        r_wc=layout["r_wc"], r_pq=layout["r_pq"],
        tau=GUMBEL_TAU, kl_weight=KL_WEIGHT)

    flops = 2 * n * LANES * LANES * 5                      # 5 padded matmuls
    bytes_accessed = (xg.size * 4 + wq.size * 2 + pf.size * 4
                      + n * LANES * 4 + 4)
    cost = pl.CostEstimate(flops=flops, transcendentals=2 * n * LANES + 2 * LANES,
                           bytes_accessed=bytes_accessed)

    vmem = pl.BlockSpec(memory_space=pltpu.MemorySpace.VMEM)
    smem = pl.BlockSpec(memory_space=pltpu.MemorySpace.SMEM)
    quantized, loss = pl.pallas_call(
        kernel,
        out_shape=(
            jax.ShapeDtypeStruct((n, LANES), jnp.float32),  # lane-dense slab
            jax.ShapeDtypeStruct((1, 1), jnp.float32),      # scalar loss (SMEM)
        ),
        in_specs=[vmem, vmem, vmem],
        out_specs=(vmem, smem),
        cost_estimate=cost,
    )(xg, wq, pf)

    output = quantized[:, :comm_dim].reshape(-1, comm_dim)
    total_loss = loss[0, 0]
    capacity = jnp.float32(0.0)            # kld_loss = 0 in the torch forward
    return output, total_loss, capacity


def _linear_init(key, fan_in, fan_out):
    """Deterministic uniform(-1/sqrt(fan_in), 1/sqrt(fan_in)) like torch Linear."""
    kw, kb = jax.random.split(key)
    bound = 1.0 / jnp.sqrt(fan_in)
    w = jax.random.uniform(kw, (fan_in, fan_out), jnp.float32, -bound, bound)
    b = jax.random.uniform(kb, (1, fan_out), jnp.float32, -bound, bound)
    return w, b


def init_params(key, input_dim, comm_dim, hidden_dim, num_protos, proto_latent_dim):
    ks = jax.random.split(key, 5)
    w_emb, b_emb = _linear_init(ks[0], input_dim, hidden_dim)
    w1, b1 = _linear_init(ks[1], hidden_dim, hidden_dim)    # layer 0 (num_layers=2)
    w2, b2 = _linear_init(ks[2], hidden_dim, comm_dim)      # layer 1
    w_mu, b_mu = _linear_init(ks[3], proto_latent_dim, proto_latent_dim)
    # fc_var exists in the torch module but its output is never used by forward().
    protos = jax.random.uniform(ks[4], (num_protos, proto_latent_dim),
                                jnp.float32, -1.0, 1.0)
    return dict(w_emb=w_emb, b_emb=b_emb, w1=w1, b1=b1, w2=w2, b2=b2,
                w_mu=w_mu, b_mu=b_mu, protos=protos)


if __name__ == "__main__":
    # Shapes consistent with VQ2(input_dim=16, output_dim=8, num_layers=2,
    # num_protos=8, num_simultaneous_tokens=1, num_imgs=1); batch = 8.
    batch = 8
    input_dim = 16
    comm_dim = 8
    hidden_dim = 64
    num_protos = 8
    num_simultaneous_tokens = 1
    proto_latent_dim = comm_dim // num_simultaneous_tokens

    key = jax.random.PRNGKey(0)
    k_params, k_x, k_gumbel = jax.random.split(key, 3)

    params = init_params(k_params, input_dim, comm_dim, hidden_dim,
                         num_protos, proto_latent_dim)
    wq, pf, layout = pack_params(params)   # done once; reused every call

    x = jax.random.normal(k_x, (batch, input_dim), jnp.float32)
    n_latents = batch * num_simultaneous_tokens
    gumbel_noise = jax.random.gumbel(k_gumbel, (n_latents, num_protos), jnp.float32)

    output, total_loss, capacity = vq2_forward(x, gumbel_noise, wq, pf, layout)
    jax.block_until_ready((output, total_loss, capacity))

    assert output.shape == (batch, comm_dim)
    assert bool(jnp.all(jnp.isfinite(output))) and bool(jnp.isfinite(total_loss))
    print("KERNEL_OK")
</pallas_src>

<mosaic_0001>
module attributes {stable_mosaic.version = 11 : i64} {
  func.func @vq2_kernel(%arg0: memref<16x128xf32, #tpu.memory_space<vmem>>, %arg1: memref<384x128xbf16, #tpu.memory_space<vmem>>, %arg2: memref<264x128xf32, #tpu.memory_space<vmem>>, %arg3: memref<8x128xf32, #tpu.memory_space<vmem>>, %arg4: memref<1x1xf32, #tpu.memory_space<smem>>) attributes {dimension_semantics = [], scalar_prefetch = 0 : i64, scratch_operands = 0 : i64, tpu.core_type = #tpu.core_type<tc>} {
    %c0 = arith.constant 0 : index
    %c0_0 = arith.constant 0 : index
    %0 = vector.load %arg0[%c0, %c0_0] : memref<16x128xf32, #tpu.memory_space<vmem>>, vector<8x128xf32>
    %c8 = arith.constant 8 : index
    %c0_1 = arith.constant 0 : index
    %1 = vector.load %arg0[%c8, %c0_1] : memref<16x128xf32, #tpu.memory_space<vmem>>, vector<8x128xf32>
    %c0_2 = arith.constant 0 : index
    %c0_3 = arith.constant 0 : index
    %2 = vector.load %arg2[%c0_2, %c0_3] : memref<264x128xf32, #tpu.memory_space<vmem>>, vector<8x128xf32>
    %3 = vector.extract_strided_slice %2 {offsets = [0, 0], sizes = [1, 128], strides = [1, 1]} : vector<8x128xf32> to vector<1x128xf32>
    %4 = vector.extract_strided_slice %2 {offsets = [1, 0], sizes = [1, 128], strides = [1, 1]} : vector<8x128xf32> to vector<1x128xf32>
    %5 = vector.extract_strided_slice %2 {offsets = [2, 0], sizes = [1, 128], strides = [1, 1]} : vector<8x128xf32> to vector<1x128xf32>
    %6 = vector.extract_strided_slice %2 {offsets = [3, 0], sizes = [1, 128], strides = [1, 1]} : vector<8x128xf32> to vector<1x128xf32>
    %7 = arith.truncf %0 : vector<8x128xf32> to vector<8x128xbf16>
    %c0_4 = arith.constant 0 : index
    %c0_5 = arith.constant 0 : index
    %8 = vector.load %arg1[%c0_4, %c0_5] : memref<384x128xbf16, #tpu.memory_space<vmem>>, vector<128x128xbf16>
    %cst = arith.constant dense<0.000000e+00> : vector<8x128xf32>
    %9 = tpu.matmul %7, %8, %cst {dimension_numbers = #tpu.dot_dimension_numbers<[1], [0], [0], [1], [0, 0, 1, 1], [], []>} : vector<8x128xbf16>, vector<128x128xbf16>, vector<8x128xf32> -> vector<8x128xf32>
    %10 = vector.broadcast %3 : vector<1x128xf32> to vector<8x128xf32>
    %11 = arith.addf %9, %10 : vector<8x128xf32>
    %12 = arith.truncf %11 : vector<8x128xf32> to vector<8x128xbf16>
    %c128 = arith.constant 128 : index
    %c0_6 = arith.constant 0 : index
    %13 = vector.load %arg1[%c128, %c0_6] : memref<384x128xbf16, #tpu.memory_space<vmem>>, vector<128x128xbf16>
    %cst_7 = arith.constant dense<0.000000e+00> : vector<8x128xf32>
    %14 = tpu.matmul %12, %13, %cst_7 {dimension_numbers = #tpu.dot_dimension_numbers<[1], [0], [0], [1], [0, 0, 1, 1], [], []>} : vector<8x128xbf16>, vector<128x128xbf16>, vector<8x128xf32> -> vector<8x128xf32>
    %15 = vector.broadcast %4 : vector<1x128xf32> to vector<8x128xf32>
    %16 = arith.addf %14, %15 : vector<8x128xf32>
    %cst_8 = arith.constant 0.000000e+00 : f32
    %17 = vector.broadcast %cst_8 : f32 to vector<8x128xf32>
    %18 = arith.maximumf %16, %17 : vector<8x128xf32>
    %19 = arith.truncf %18 : vector<8x128xf32> to vector<8x128xbf16>
    %c256 = arith.constant 256 : index
    %c0_9 = arith.constant 0 : index
    %20 = vector.load %arg1[%c256, %c0_9] : memref<384x128xbf16, #tpu.memory_space<vmem>>, vector<128x128xbf16>
    %cst_10 = arith.constant dense<0.000000e+00> : vector<8x128xf32>
    %21 = tpu.matmul %19, %20, %cst_10 {dimension_numbers = #tpu.dot_dimension_numbers<[1], [0], [0], [1], [0, 0, 1, 1], [], []>} : vector<8x128xbf16>, vector<128x128xbf16>, vector<8x128xf32> -> vector<8x128xf32>
    %22 = vector.broadcast %5 : vector<1x128xf32> to vector<8x128xf32>
    %23 = arith.addf %21, %22 : vector<8x128xf32>
    %cst_11 = arith.constant 0.000000e+00 : f32
    %24 = vector.broadcast %cst_11 : f32 to vector<8x128xf32>
    %25 = arith.maximumf %23, %24 : vector<8x128xf32>
    %c8_12 = arith.constant 8 : index
    %c0_13 = arith.constant 0 : index
    %26 = vector.load %arg2[%c8_12, %c0_13] : memref<264x128xf32, #tpu.memory_space<vmem>>, vector<128x128xf32>
    %cst_14 = arith.constant dense<0.000000e+00> : vector<8x128xf32>
    %27 = tpu.matmul %25, %26, %cst_14 {dimension_numbers = #tpu.dot_dimension_numbers<[1], [0], [0], [1], [0, 0, 1, 1], [], []>} : vector<8x128xf32>, vector<128x128xf32>, vector<8x128xf32> -> vector<8x128xf32>
    %28 = vector.broadcast %6 : vector<1x128xf32> to vector<8x128xf32>
    %29 = arith.addf %27, %28 : vector<8x128xf32>
    %cst_15 = arith.constant dense<0xFF800000> : vector<8xf32>
    %30 = vector.multi_reduction <maximumf>, %29, %cst_15 [1] : vector<8x128xf32> to vector<8xf32>
    %31 = vector.shape_cast %30 : vector<8xf32> to vector<8x1xf32>
    %32 = vector.broadcast %31 : vector<8x1xf32> to vector<8x128xf32>
    %33 = arith.subf %29, %32 : vector<8x128xf32>
    %34 = math.exp %33 : vector<8x128xf32>
    %cst_16 = arith.constant dense<0.000000e+00> : vector<8xf32>
    %35 = vector.multi_reduction <add>, %34, %cst_16 [1] : vector<8x128xf32> to vector<8xf32>
    %36 = vector.shape_cast %35 : vector<8xf32> to vector<8x1xf32>
    %37 = math.log %36 : vector<8x1xf32>
    %38 = vector.broadcast %37 : vector<8x1xf32> to vector<8x128xf32>
    %39 = arith.subf %33, %38 : vector<8x128xf32>
    %40 = vector.broadcast %36 : vector<8x1xf32> to vector<8x128xf32>
    %41 = arith.divf %34, %40 : vector<8x128xf32>
    %42 = arith.addf %29, %1 : vector<8x128xf32>
    %cst_17 = arith.constant 1.000000e+00 : f32
    %43 = vector.broadcast %cst_17 : f32 to vector<8x128xf32>
    %44 = arith.mulf %42, %43 : vector<8x128xf32>
    %cst_18 = arith.constant dense<0xFF800000> : vector<8xf32>
    %45 = vector.multi_reduction <maximumf>, %44, %cst_18 [1] : vector<8x128xf32> to vector<8xf32>
    %46 = vector.shape_cast %45 : vector<8xf32> to vector<8x1xf32>
    %47 = tpu.iota {dimensions = array<i32: 1>} : vector<8x128xi32>
    %48 = vector.broadcast %46 : vector<8x1xf32> to vector<8x128xf32>
    %49 = arith.cmpf oge, %44, %48 : vector<8x128xf32>
    %c128_i32 = arith.constant 128 : i32
    %50 = vector.broadcast %c128_i32 : i32 to vector<8x128xi32>
    %51 = arith.select %49, %47, %50 : vector<8x128xi1>, vector<8x128xi32>
    %cst_19 = arith.constant dense<2147483647> : vector<8xi32>
    %52 = vector.multi_reduction <minsi>, %51, %cst_19 [1] : vector<8x128xi32> to vector<8xi32>
    %53 = vector.shape_cast %52 : vector<8xi32> to vector<8x1xi32>
    %54 = vector.broadcast %53 : vector<8x1xi32> to vector<8x128xi32>
    %55 = arith.cmpi eq, %47, %54 : vector<8x128xi32>
    %56 = arith.extui %55 : vector<8x128xi1> to vector<8x128xi32>
    %57 = arith.sitofp %56 : vector<8x128xi32> to vector<8x128xf32>
    %c136 = arith.constant 136 : index
    %c0_20 = arith.constant 0 : index
    %58 = vector.load %arg2[%c136, %c0_20] : memref<264x128xf32, #tpu.memory_space<vmem>>, vector<128x128xf32>
    %cst_21 = arith.constant dense<0.000000e+00> : vector<8x128xf32>
    %59 = tpu.matmul %57, %58, %cst_21 {dimension_numbers = #tpu.dot_dimension_numbers<[1], [0], [0], [1], [0, 0, 1, 1], [], []>} : vector<8x128xf32>, vector<128x128xf32>, vector<8x128xf32> -> vector<8x128xf32>
    %c0_22 = arith.constant 0 : index
    %c0_23 = arith.constant 0 : index
    %60 = vector.load %arg3[%c0_22, %c0_23] : memref<8x128xf32, #tpu.memory_space<vmem>>, vector<8x128xf32>
    tpu.vector_store %arg3[%c0_22, %c0_23], %59 {strides = array<i32>} : memref<8x128xf32, #tpu.memory_space<vmem>>, vector<8x128xf32>,
    %cst_24 = arith.constant 9.99999997E-7 : f32
    %61 = vector.broadcast %cst_24 : f32 to vector<8x128xf32>
    %62 = arith.addf %41, %61 : vector<8x128xf32>
    %cst_25 = arith.constant dense<0.000000e+00> : vector<128xf32>
    %63 = vector.multi_reduction <add>, %62, %cst_25 [0] : vector<8x128xf32> to vector<128xf32>
    %64 = vector.shape_cast %63 : vector<128xf32> to vector<1x128xf32>
    %cst_26 = arith.constant 8.000000e+00 : f32
    %65 = vector.broadcast %cst_26 : f32 to vector<1x128xf32>
    %66 = arith.divf %64, %65 : vector<1x128xf32>
    %67 = math.log %66 : vector<1x128xf32>
    %cst_27 = arith.constant dense<0.000000e+00> : vector<128xf32>
    %68 = vector.multi_reduction <add>, %39, %cst_27 [0] : vector<8x128xf32> to vector<128xf32>
    %69 = vector.shape_cast %68 : vector<128xf32> to vector<1x128xf32>
    %70 = tpu.iota {dimensions = array<i32: 1>} : vector<1x128xi32>
    %c8_i32 = arith.constant 8 : i32
    %71 = vector.broadcast %c8_i32 : i32 to vector<1x128xi32>
    %72 = arith.cmpi slt, %70, %71 : vector<1x128xi32>
    %cst_28 = arith.constant 1.250000e-01 : f32
    %73 = vector.broadcast %cst_28 : f32 to vector<1x128xf32>
    %74 = arith.mulf %69, %73 : vector<1x128xf32>
    %75 = arith.subf %67, %74 : vector<1x128xf32>
    %76 = arith.mulf %66, %75 : vector<1x128xf32>
    %cst_29 = arith.constant 0.000000e+00 : f32
    %77 = vector.broadcast %cst_29 : f32 to vector<1x128xf32>
    %78 = arith.select %72, %76, %77 : vector<1x128xi1>, vector<1x128xf32>
    %79 = vector.shape_cast %78 : vector<1x128xf32> to vector<1x1x128xf32>
    %cst_30 = arith.constant dense<0.000000e+00> : vector<1xf32>
    %80 = vector.multi_reduction <add>, %79, %cst_30 [1, 2] : vector<1x1x128xf32> to vector<1xf32>
    %81 = vector.shape_cast %80 : vector<1xf32> to vector<1x1x1xf32>
    %82 = vector.extract %81[0, 0, 0] : f32 from vector<1x1x1xf32>
    %cst_31 = arith.constant 0.000000e+00 : f32
    %83 = vector.broadcast %cst_31 : f32 to vector<1x128xf32>
    %84 = arith.subf %83, %66 : vector<1x128xf32>
    %85 = arith.mulf %84, %67 : vector<1x128xf32>
    %cst_32 = arith.constant 0.000000e+00 : f32
    %86 = vector.broadcast %cst_32 : f32 to vector<1x128xf32>
    %87 = arith.select %72, %85, %86 : vector<1x128xi1>, vector<1x128xf32>
    %88 = vector.shape_cast %87 : vector<1x128xf32> to vector<1x1x128xf32>
    %cst_33 = arith.constant dense<0.000000e+00> : vector<1xf32>
    %89 = vector.multi_reduction <add>, %88, %cst_33 [1, 2] : vector<1x1x128xf32> to vector<1xf32>
    %90 = vector.shape_cast %89 : vector<1xf32> to vector<1x1x1xf32>
    %91 = vector.extract %90[0, 0, 0] : f32 from vector<1x1x1xf32>
    %cst_34 = arith.constant 0.00999999977 : f32
    %92 = arith.mulf %cst_34, %82 : f32
    %cst_35 = arith.constant 0.00999999977 : f32
    %93 = arith.mulf %cst_35, %91 : f32
    %94 = arith.addf %92, %93 : f32
    %c0_36 = arith.constant 0 : index
    %c0_37 = arith.constant 0 : index
    %95 = memref.load %arg4[%c0_36, %c0_37] : memref<1x1xf32, #tpu.memory_space<smem>>
    memref.store %94, %arg4[%c0_36, %c0_37] : memref<1x1xf32, #tpu.memory_space<smem>>
    return
  }
}

</mosaic_0001>

<bundles_post_ra>
// kernel: tpu_custom_call.1
= control target key start
LH: loop header
LB: loop body
LE: loop exit
PB: predicated region body
PF: predicated region fallthrough
CT: control target
= control target key end

     0   :  { %10 = vsyncpa [#allocation3], 0  ;;  %s1276_s0 = inlined_call_operand.hbm [shape: f32[16,128], index: 0, kind: input, shape index: {}]   ;;  %s1277_s1 = inlined_call_operand.hbm [shape: bf16[384,128], index: 1, kind: input, shape index: {}]   ;;  %s1278_s2 = inlined_call_operand.hbm [shape: f32[264,128], index: 2, kind: input, shape index: {}]   ;;  %s1279_s3 = inlined_call_operand.hbm [shape: f32[8,128], index: 3, kind: output, shape index: {0}]   ;;  %s1280_s4 = inlined_call_operand.hbm [shape: f32[1,1], index: 4, kind: output, shape index: {1}]  }
   0x1   :  { %11 = vsyncpa [#allocation7], 0 }
   0x2   :  { %12 = vsyncpa [#allocation4], 0 }
   0x3   :  { %13 = vsyncpa [#allocation5], 0  ;;  %s1105_s15 = smov [#allocation6]   ;;  %s999_s19 = scalar_lea.hbm %s1277_s1, 3072 }
   0x4   :  { %s31_s16 = sshll.u32 %s1105_s15, 4  ;;  %p1000_p0 = scmp.ne.s32.totalorder %s1277_s1, %s999_s19  ;;  %s32_s16 = int_to_ptr.vmem [resolvable:$true] %s31_s16 }
   0x5   :  { %p1003_p1 = scmp.lt.u32.totalorder %s999_s19, %s1277_s1 }
   0x7   :  { %p1005_p2 = pnand %p1003_p1, %p1000_p0 }
   0x9   :  { %1008 = shalt.err (!%p1005_p2)
}
   0xa   :  { %s1009_s24 = scalar_lea.vmem %s32_s16, 3072  ;;  %p1014_p4 = scmp.lt.s32.totalorder %s32_s16, %s32_s16 }
   0xb   :  { %p1010_p3 = scmp.ne.s32.totalorder %s32_s16, %s1009_s24  ;;  %p1015_p5 = scmp.lt.s32.totalorder %s1009_s24, %s1009_s24 }
   0xd   :  { %p1016_p6 = por %p1015_p5, %p1014_p4 }
   0xf   :  { %p1017_p7 = pnand %p1016_p6, %p1010_p3 }
  0x11   :  { %1020 = shalt.err (!%p1017_p7)
}
  0x12   :  { %s1106_s25 = smov 64   ;;  %s1107_s26 = smov 4  }
  0x13   :  { %37 = dma.hbm_to_vmem [thread:$0]  %s1277_s1, 3072, %s32_s16, [#allocation7], %s1106_s25, %s1106_s25, %s1107_s26  }
  0x14   :  { %s1108_s29 = smov [#allocation2]   ;;  %s1021_s7 = scalar_lea.hbm %s1276_s0, 256 }
  0x15   :  { %s19_s30 = sshll.u32 %s1108_s29, 4  ;;  %p1022_p8 = scmp.ne.s32.totalorder %s1276_s0, %s1021_s7  ;;  %s20_s30 = int_to_ptr.vmem [resolvable:$true] %s19_s30 }
  0x16   :  { %p1025_p9 = scmp.lt.u32.totalorder %s1021_s7, %s1276_s0 }
  0x18   :  { %p1027_p10 = pnand %p1025_p9, %p1022_p8 }
  0x1a   :  { %1030 = shalt.err (!%p1027_p10)
}
  0x1b   :  { %s1031_s12 = scalar_lea.vmem %s20_s30, 256  ;;  %p1036_p12 = scmp.lt.s32.totalorder %s20_s30, %s20_s30 }
  0x1c   :  { %p1032_p11 = scmp.ne.s32.totalorder %s20_s30, %s1031_s12  ;;  %p1037_p13 = scmp.lt.s32.totalorder %s1031_s12, %s1031_s12 }
  0x1e   :  { %p1038_p0 = por %p1037_p13, %p1036_p12 }
  0x20   :  { %p1039_p1 = pnand %p1038_p0, %p1032_p11 }
  0x22   :  { %1042 = shalt.err (!%p1039_p1)
}
  0x23   :  { %s1109_s1 = smov 128   ;;  %s1110_s13 = smov 8  }
  0x24   :  { %25 = dma.hbm_to_vmem [thread:$0]  %s1276_s0, 256, %s20_s30, [#allocation3], %s1109_s1, %s1109_s1, %s1110_s13  }
  0x25   :  { %s1111_s16 = smov [#allocation8]   ;;  %s1043_s20 = scalar_lea.hbm %s1278_s2, 4224 }
  0x26   :  { %s43_s17 = sshll.u32 %s1111_s16, 4  ;;  %p1044_p2 = scmp.ne.s32.totalorder %s1278_s2, %s1043_s20  ;;  %s44_s17 = int_to_ptr.vmem [resolvable:$true] %s43_s17 }
  0x27   :  { %p1047_p3 = scmp.lt.u32.totalorder %s1043_s20, %s1278_s2 }
  0x29   :  { %p1049_p4 = pnand %p1047_p3, %p1044_p2 }
  0x2b   :  { %1052 = shalt.err (!%p1049_p4)
}
  0x2c   :  { %s1053_s25 = scalar_lea.vmem %s44_s17, 4224  ;;  %p1058_p6 = scmp.lt.s32.totalorder %s44_s17, %s44_s17 }
  0x2d   :  { %p1054_p5 = scmp.ne.s32.totalorder %s44_s17, %s1053_s25  ;;  %p1059_p7 = scmp.lt.s32.totalorder %s1053_s25, %s1053_s25 }
  0x2f   :  { %p1060_p8 = por %p1059_p7, %p1058_p6 }
  0x31   :  { %p1061_p9 = pnand %p1060_p8, %p1054_p5 }
  0x33   :  { %1064 = shalt.err (!%p1061_p9)
}
  0x34   :  { %49 = dma.hbm_to_vmem [thread:$0]  %s1278_s2, 4224, %s44_s17, [#allocation7], %s1109_s1, %s1109_s1, %s1110_s13  }
  0x35   :  { %1097 = dma.done.wait [#allocation3], 256  }
  0x36   :  { %1098 = vsyncadd [#allocation3], 4294967040 }
  0x37   :  { %1099 = dma.done.wait [#allocation7], 7296  }
  0x38   :  { %1100 = vsyncadd [#allocation7], 4294960000  ;;  %v1112_v0 = vmov 0.0   ;;  %vm1113_vm0 = vmmov 0   ;;  %v967_v1 = vld [vmem:[#allocation6] sm:$0xff]   ;;  %v968_v2 = vld [vmem:[#allocation6 + $0x8] sm:$0xff]   ;;  %v80_v25 = vlaneseq }
  0x39   :  { %772 = vmatprep.subr.bf16.mxu0 %v1112_v0  ;;  %788 = vmatprep.mubr.msk.bf16.mxu0 %vm1113_vm0, %v1112_v0  ;;  %v969_v3 = vld [vmem:[#allocation6 + $0x10] sm:$0xff]   ;;  %v975_v4 = vld [vmem:[#allocation6 + $0x40] sm:$0xff]   ;;  %v970_v5 = vld [vmem:[#allocation6 + $0x18] sm:$0xff]   ;;  %v1114_v41 = vmov 0.0|0.0   ;;  %vm627_vm4 = vcmask 1040384   ;;  %s1065_s7 = scalar_lea.hbm %s1280_s4, 16 }
  0x3a   :  { %792 = vmatprep.subr.bf16.mxu1 %v1112_v0  ;;  %808 = vmatprep.mubr.msk.bf16.mxu1 %vm1113_vm0, %v1112_v0  ;;  %v976_v6 = vld [vmem:[#allocation6 + $0x48] sm:$0xff]   ;;  %v971_v7 = vld [vmem:[#allocation6 + $0x20] sm:$0xff]   ;;  %v977_v8 = vld [vmem:[#allocation6 + $0x50] sm:$0xff]   ;;  %v1209_v26 = vshrl.u32 %v80_v25, 7  ;;  %p1066_p10 = scmp.ne.s32.totalorder %s1280_s4, %s1065_s7  ;;  %p1069_p11 = scmp.lt.u32.totalorder %s1065_s7, %s1280_s4 }
  0x3b   :  { %773 = vmatpush3.bf16.msra.mxu0 %v967_v1  ;;  %793 = vmatpush3.bf16.msra.mxu1 %v975_v4  ;;  %v972_v9 = vld [vmem:[#allocation6 + $0x28] sm:$0xff]   ;;  %v978_v10 = vld [vmem:[#allocation6 + $0x58] sm:$0xff]   ;;  %v973_v11 = vld [vmem:[#allocation6 + $0x30] sm:$0xff]  }
  0x3c   :  { %774 = vmatprep.subr.bf16.mxu0 %v1112_v0  ;;  %794 = vmatprep.subr.bf16.mxu1 %v1112_v0  ;;  %v979_v12 = vld [vmem:[#allocation6 + $0x60] sm:$0xff]   ;;  %v974_v13 = vld [vmem:[#allocation6 + $0x38] sm:$0xff]   ;;  %v60_v14 = vld [vmem:[#allocation2] sm:$0xff]  ;;  %v82_v27 = vsub.s32 0, %v1209_v26  ;;  %v191_v60 = vsub.s32 1, %v1209_v26  ;;  %p1071_p12 = pnand %p1069_p11, %p1066_p10 }
  0x3d   :  { %v980_v15 = vld [vmem:[#allocation6 + $0x68] sm:$0xff]   ;;  %v63_v16 = vpack.c.bf16 %v60_v14, %v60_v14  ;;  %v981_v17 = vld [vmem:[#allocation6 + $0x70] sm:$0xff]   ;;  %v982_v18 = vld [vmem:[#allocation6 + $0x78] sm:$0xff]  }
  0x3e   :  { %v983_v19 = vld [vmem:[#allocation6 + $0x80] sm:$0xff]   ;;  %v984_v20 = vld [vmem:[#allocation6 + $0x88] sm:$0xff]   ;;  %v985_v21 = vld [vmem:[#allocation6 + $0x90] sm:$0xff]  }
  0x3f   :  { %775 = vmatpush3.bf16.msra.mxu0 %v968_v2  ;;  %795 = vmatpush3.bf16.msra.mxu1 %v976_v6  ;;  %v986_v22 = vld [vmem:[#allocation6 + $0x98] sm:$0xff]   ;;  %v987_v23 = vld [vmem:[#allocation6 + $0xa0] sm:$0xff]   ;;  %v988_v24 = vld [vmem:[#allocation6 + $0xa8] sm:$0xff]  }
  0x40   :  { %776 = vmatprep.subr.bf16.mxu0 %v1112_v0  ;;  %796 = vmatprep.subr.bf16.mxu1 %v1112_v0  ;;  %v1212_v28 = vld [vmem:[#allocation8] sm:$0xff]  ;;  %v989_v36 = vld [vmem:[#allocation6 + $0xb0] sm:$0xff]   ;;  %v990_v37 = vld [vmem:[#allocation6 + $0xb8] sm:$0xff]  }
  0x41   :  { %v83_v29 = vrot.slane %v1212_v28, %v82_v27  ;;  %v392_v38 = vld [vmem:[#allocation8 + $0x8] sm:$0xff]  ;;  %v393_v39 = vld [vmem:[#allocation8 + $0x10] sm:$0xff]  ;;  %v394_v40 = vld [vmem:[#allocation8 + $0x18] sm:$0xff]  ;;  %v192_v61 = vrot.slane %v1212_v28, %v191_v60 }
  0x42   :  { %v903_v42 = vpack.c.bf16 %v393_v39, %v392_v38  ;;  %v395_v43 = vld [vmem:[#allocation8 + $0x20] sm:$0xff]  ;;  %v396_v45 = vld [vmem:[#allocation8 + $0x28] sm:$0xff]  ;;  %v397_v46 = vld [vmem:[#allocation8 + $0x30] sm:$0xff] }
  0x43   :  { %777 = vmatpush3.bf16.msra.mxu0 %v969_v3  ;;  %797 = vmatpush3.bf16.msra.mxu1 %v977_v8  ;;  %v906_v44 = vpack.c.bf16 %v395_v43, %v394_v40  ;;  %v909_v47 = vpack.c.bf16 %v397_v46, %v396_v45  ;;  %v398_v48 = vld [vmem:[#allocation8 + $0x38] sm:$0xff]  ;;  %v399_v49 = vld [vmem:[#allocation8 + $0x40] sm:$0xff]  ;;  %v400_v51 = vld [vmem:[#allocation8 + $0x48] sm:$0xff] }
  0x44   :  { %778 = vmatprep.subr.bf16.mxu0 %v1112_v0  ;;  %798 = vmatprep.subr.bf16.mxu1 %v1112_v0  ;;  %v912_v50 = vpack.c.bf16 %v399_v49, %v398_v48  ;;  %v401_v52 = vld [vmem:[#allocation8 + $0x50] sm:$0xff]  ;;  %v402_v54 = vld [vmem:[#allocation8 + $0x58] sm:$0xff]  ;;  %v403_v55 = vld [vmem:[#allocation8 + $0x60] sm:$0xff] }
  0x45   :  { %v915_v53 = vpack.c.bf16 %v401_v52, %v400_v51  ;;  %v918_v56 = vpack.c.bf16 %v403_v55, %v402_v54  ;;  %v404_v57 = vld [vmem:[#allocation8 + $0x68] sm:$0xff]  ;;  %v405_v58 = vld [vmem:[#allocation8 + $0x70] sm:$0xff]  ;;  %v406_v6 = vld [vmem:[#allocation8 + $0x78] sm:$0xff] }
  0x46   :  { %v921_v59 = vpack.c.bf16 %v405_v58, %v404_v57  ;;  %v522_v38 = vld [vmem:[#allocation8 + $0xa8] sm:$0xff]  ;;  %v523_v39 = vld [vmem:[#allocation8 + $0xb0] sm:$0xff]  ;;  %v525_v43 = vld [vmem:[#allocation8 + $0xc0] sm:$0xff] }
  0x47   :  { %779 = vmatpush3.bf16.msra.mxu0 %v970_v5  ;;  %799 = vmatpush3.bf16.msra.mxu1 %v978_v10  ;;  %v933_v40 = vpack.c.bf16 %v523_v39, %v522_v38  ;;  %v526_v45 = vld [vmem:[#allocation8 + $0xc8] sm:$0xff]  ;;  %v527_v46 = vld [vmem:[#allocation8 + $0xd0] sm:$0xff]  ;;  %v528_v48 = vld [vmem:[#allocation8 + $0xd8] sm:$0xff] }
  0x48   :  { %780 = vmatprep.subr.bf16.mxu0 %v1112_v0  ;;  %800 = vmatprep.subr.bf16.mxu1 %v1112_v0  ;;  %v529_v49 = vld [vmem:[#allocation8 + $0xe0] sm:$0xff]  ;;  %v530_v51 = vld [vmem:[#allocation8 + $0xe8] sm:$0xff]  ;;  %v531_v52 = vld [vmem:[#allocation8 + $0xf0] sm:$0xff] }
  0x49   :  { %v533_v60 = vld [vmem:[#allocation8 + $0x100] sm:$0xff] }
  0x4b   :  { %781 = vmatpush3.bf16.msra.mxu0 %v971_v7  ;;  %801 = vmatpush3.bf16.msra.mxu1 %v979_v12  ;;  %v407_v7 = vld [vmem:[#allocation8 + $0x80] sm:$0xff] }
  0x4c   :  { %782 = vmatprep.subr.bf16.mxu0 %v1112_v0  ;;  %802 = vmatprep.subr.bf16.mxu1 %v1112_v0  ;;  %v924_v8 = vpack.c.bf16 %v407_v7, %v406_v6 }
  0x4f   :  { %783 = vmatpush3.bf16.msra.mxu0 %v972_v9  ;;  %803 = vmatpush3.bf16.msra.mxu1 %v980_v15  ;;  %v301_v9 = vsub.s32 2, %v1209_v26 }
  0x50   :  { %784 = vmatprep.subr.bf16.mxu0 %v1112_v0  ;;  %804 = vmatprep.subr.bf16.mxu1 %v1112_v0 }
  0x51   :  { %v302_v10 = vrot.slane %v1212_v28, %v301_v9 }
  0x53   :  { %785 = vmatpush3.bf16.msra.mxu0 %v973_v11  ;;  %805 = vmatpush3.bf16.msra.mxu1 %v981_v17  ;;  %v410_v17 = vsub.s32 3, %v1209_v26 }
  0x54   :  { %786 = vmatprep.subr.bf16.mxu0 %v1112_v0  ;;  %806 = vmatprep.subr.bf16.mxu1 %v1112_v0 }
  0x57   :  { %787 = vmatpush3.bf16.msra.mxu0 %v974_v13  ;;  %807 = vmatpush3.bf16.msra.mxu1 %v982_v18  ;;  %v411_v18 = vrot.slane %v1212_v28, %v410_v17 }
  0x58   :  { %812 = vmatprep.subr.bf16.mxu0 %v1112_v0  ;;  %902 = vmatprep.subr.bf16.mxu1 %v1114_v41 }
  0x5a   :  { %789 = vmatmul.mubr.bf16.vlgmr.msra.gmra.mrb[0].mxu0 %v63_v16 }
  0x5b   :  { %828 = vmatprep.mubr.msk.bf16.mxu0 %vm1113_vm0, %v1112_v0  ;;  %813 = vmatpush3.bf16.msra.mxu0 %v983_v19  ;;  %v61_v19 = vld [vmem:[#allocation2 + $0x8] sm:$0xff] }
  0x5c   :  { %814 = vmatprep.subr.bf16.mxu0 %v1112_v0 }
  0x5f   :  { %815 = vmatpush3.bf16.msra.mxu0 %v984_v20 }
  0x60   :  { %816 = vmatprep.subr.bf16.mxu0 %v1112_v0 }
  0x63   :  { %817 = vmatpush3.bf16.msra.mxu0 %v985_v21 }
  0x64   :  { %818 = vmatprep.subr.bf16.mxu0 %v1112_v0 }
  0x67   :  { %819 = vmatpush3.bf16.msra.mxu0 %v986_v22 }
  0x68   :  { %820 = vmatprep.subr.bf16.mxu0 %v1112_v0 }
  0x6b   :  { %821 = vmatpush3.bf16.msra.mxu0 %v987_v23 }
  0x6c   :  { %822 = vmatprep.subr.bf16.mxu0 %v1112_v0 }
  0x6f   :  { %823 = vmatpush3.bf16.msra.mxu0 %v988_v24  ;;  %v1236_v24 = vand.u32 127, %v80_v25  ;;  %v521_v25 = vld [vmem:[#allocation8 + $0xa0] sm:$0xff] }
  0x70   :  { %824 = vmatprep.subr.bf16.mxu0 %v1112_v0 }
  0x71   :  { %vm622_vm3 = vcmp.lt.s32.totalorder %v1236_v24, 8 }
  0x73   :  { %825 = vmatpush3.bf16.msra.mxu0 %v989_v36 }
  0x74   :  { %826 = vmatprep.subr.bf16.mxu0 %v1112_v0 }
  0x77   :  { %827 = vmatpush3.bf16.msra.mxu0 %v990_v37 }
  0x78   :  { %926 = vmatprep.subr.bf16.mxu0 %v1114_v41 }
 0x12d   :  { %v166_v30 = vpop.f32.mrb[0].mxu0 }
 0x12e   :  { %v167_v31 = vadd.f32 %v166_v30, %v83_v29  ;;  %v790_v32 = vpop.f32.mrb[1].mxu0 }
 0x12f   :  { %v169_v33 = vpop.f32.mrb[2].mxu0 }
 0x130   :  { %v172_v34 = vpack.c.bf16 %v167_v31, %v167_v31  ;;  %v791_v35 = vpop.f32.mrb[3].mxu0  ;;  %v518_v33 = vld [vmem:[#allocation8 + $0x88] sm:$0xff] }
 0x131   :  { %v520_v35 = vld [vmem:[#allocation8 + $0x98] sm:$0xff] }
 0x132   :  { %809 = vmatmul.mubr.bf16.vlgmr.msra.gmra.mrb[0].mxu1 %v172_v34  ;;  %v519_v34 = vld [vmem:[#allocation8 + $0x90] sm:$0xff]  ;;  %v930_v37 = vpack.c.bf16 %v521_v25, %v520_v35 }
 0x133   :  { %864 = vmatprep.mubr.msk.f32.mxu1 %vm1113_vm0, %v1112_v0  ;;  %904 = vmatpush3.bf16.msra.mxu1 %v903_v42  ;;  %v927_v36 = vpack.c.bf16 %v519_v34, %v518_v33  ;;  %v524_v42 = vld [vmem:[#allocation8 + $0xb8] sm:$0xff]  ;;  %v1115_v34 = vmov 1.0  }
 0x134   :  { %905 = vmatprep.subr.bf16.mxu1 %v1114_v41 }
 0x137   :  { %907 = vmatpush3.bf16.msra.mxu1 %v906_v44  ;;  %v936_v44 = vpack.c.bf16 %v525_v43, %v524_v42 }
 0x138   :  { %908 = vmatprep.subr.bf16.mxu1 %v1114_v41 }
 0x13b   :  { %910 = vmatpush3.bf16.msra.mxu1 %v909_v47  ;;  %v939_v47 = vpack.c.bf16 %v527_v46, %v526_v45 }
 0x13c   :  { %911 = vmatprep.subr.bf16.mxu1 %v1114_v41 }
 0x13f   :  { %913 = vmatpush3.bf16.msra.mxu1 %v912_v50  ;;  %v942_v50 = vpack.c.bf16 %v529_v49, %v528_v48 }
 0x140   :  { %914 = vmatprep.subr.bf16.mxu1 %v1114_v41 }
 0x143   :  { %916 = vmatpush3.bf16.msra.mxu1 %v915_v53  ;;  %v945_v53 = vpack.c.bf16 %v531_v52, %v530_v51 }
 0x144   :  { %917 = vmatprep.subr.bf16.mxu1 %v1114_v41 }
 0x147   :  { %919 = vmatpush3.bf16.msra.mxu1 %v918_v56 }
 0x148   :  { %920 = vmatprep.subr.bf16.mxu1 %v1114_v41 }
 0x14b   :  { %922 = vmatpush3.bf16.msra.mxu1 %v921_v59  ;;  %v532_v59 = vld [vmem:[#allocation8 + $0xf8] sm:$0xff] }
 0x14c   :  { %923 = vmatprep.subr.bf16.mxu1 %v1114_v41 }
 0x14f   :  { %925 = vmatpush3.bf16.msra.mxu1 %v924_v8 }
 0x205   :  { %v275_v62 = vpop.f32.mrb[0].mxu1 }
 0x206   :  { %v276_v63 = vadd.f32 %v275_v62, %v192_v61  ;;  %v810_v1 = vpop.f32.mrb[1].mxu1  ;;  %v948_v62 = vpack.c.bf16 %v533_v60, %v532_v59 }
 0x207   :  { %v278_v2 = vpop.f32.mrb[2].mxu1 }
 0x208   :  { %v281_v3 = vmax.f32 %v276_v63, 0.0  ;;  %v811_v4 = vpop.f32.mrb[3].mxu1 }
 0x20a   :  { %v282_v5 = vpack.c.bf16 %v281_v3, %v281_v3 }
 0x20c   :  { %829 = vmatmul.mubr.bf16.vlgmr.msra.gmra.mrb[4].mxu0 %v282_v5 }
 0x20d   :  { %899 = vmatprep.mubr.msk.f32.mxu0 %vm1113_vm0, %v1112_v0  ;;  %928 = vmatpush3.bf16.msra.mxu0 %v927_v36 }
 0x20e   :  { %929 = vmatprep.subr.bf16.mxu0 %v1114_v41 }
 0x211   :  { %931 = vmatpush3.bf16.msra.mxu0 %v930_v37 }
 0x212   :  { %932 = vmatprep.subr.bf16.mxu0 %v1114_v41 }
 0x215   :  { %934 = vmatpush3.bf16.msra.mxu0 %v933_v40 }
 0x216   :  { %935 = vmatprep.subr.bf16.mxu0 %v1114_v41 }
 0x219   :  { %937 = vmatpush3.bf16.msra.mxu0 %v936_v44 }
 0x21a   :  { %938 = vmatprep.subr.bf16.mxu0 %v1114_v41 }
 0x21d   :  { %940 = vmatpush3.bf16.msra.mxu0 %v939_v47 }
 0x21e   :  { %941 = vmatprep.subr.bf16.mxu0 %v1114_v41 }
 0x221   :  { %943 = vmatpush3.bf16.msra.mxu0 %v942_v50 }
 0x222   :  { %944 = vmatprep.subr.bf16.mxu0 %v1114_v41 }
 0x225   :  { %946 = vmatpush3.bf16.msra.mxu0 %v945_v53 }
 0x226   :  { %947 = vmatprep.subr.bf16.mxu0 %v1114_v41 }
 0x229   :  { %949 = vmatpush3.bf16.msra.mxu0 %v948_v62 }
 0x2df   :  { %v385_v11 = vpop.f32.mrb[4].mxu0 }
 0x2e0   :  { %v386_v12 = vadd.f32 %v385_v11, %v302_v10  ;;  %v830_v13 = vpop.f32.mrb[5].mxu0 }
 0x2e1   :  { %v388_v14 = vpop.f32.mrb[6].mxu0 }
 0x2e2   :  { %v391_v15 = vmax.f32 %v386_v12, 0.0  ;;  %v831_v16 = vpop.f32.mrb[7].mxu0 }
 0x2e4   :  { %865 = vmatmul.mubr.f32.vlgmr.msra.gmra.mrb[4].mxu1 %v391_v15 }
 0x3b7   :  { %v478_v0 = vpop.f32.mrb[4].mxu1 }
 0x3b8   :  { %v479_v20 = vadd.f32 %v478_v0, %v411_v18  ;;  %v866_v21 = vpop.f32.mrb[5].mxu1 }
 0x3ba   :  { %482 = vmax.xlane.f32.xlu1 %v479_v20  ;;  %v494_v22 = vadd.f32 %v479_v20, %v61_v19 }
 0x3bc   :  { %495 = vmax.xlane.f32.xlu0 %v494_v22 }
 0x447   :  { %v483_v23 = vpop.xlane.xlu1 %482 }
 0x448   :  { %v1238_v27 = vsub.f32 %v479_v20, %v483_v23 }
 0x449   :  { %v496_v29 = vpop.xlane.xlu0 %495 }
 0x44a   :  { %v485_v30 = vmul.f32 1.442695, %v1238_v27  ;;  %vm499_vm1 = vcmp.ge.f32.partialorder %v494_v22, %v496_v29 }
 0x44b   :  { %v500_v26 = vsel %vm499_vm1, %v1236_v24, 128 }
 0x44c   :  { %991 = vpow2.f32 %v485_v30  ;;  %v502_v28 = vshra.s32 %v500_v26, 16  ;;  %v501_v54 = vand.u32 65535, %v500_v26 }
 0x44e   :  { %v504_v31 = vcvt.s32.f32 %v502_v28  ;;  %v503_v56 = vcvt.s32.f32 %v501_v54 }
 0x450   :  { %505 = vmin.xlane.f32.xlu0 %v504_v31 }
 0x456   :  { %v992_v32 = vpop.eup %991 }
 0x457   :  { %487 = vadd.xlane.f32.xlu0 %v992_v32 }
 0x4dd   :  { %v506_v55 = vpop.xlane.xlu0 %505 }
 0x4de   :  { %vm507_vm2 = vcmp.eq.f32.partialorder %v504_v31, %v506_v55  ;;  %v512_v26 = vcvt.f32.s32 %v506_v55 }
 0x4df   :  { %v508_v57 = vsel %vm507_vm2, %v503_v56, inf }
 0x4e0   :  { %509 = vmin.xlane.f32.xlu1 %v508_v57  ;;  %v513_v31 = vshll.u32 %v512_v26, 16 }
 0x4e4   :  { %v488_v58 = vpop.xlane.xlu0 %487 }
 0x4e5   :  { %993 = vlog2.f32 %v488_v58 }
 0x4e6   :  { %995 = vrcp.f32 %v488_v58 }
 0x4ef   :  { %v994_v61 = vpop.eup %993 }
 0x4f0   :  { %v996_v63 = vpop.eup %995  ;;  %v490_v1 = vmul.f32 0.6931472, %v994_v61 }
 0x4f1   :  { %v493_v2 = vmul.f32 %v996_v63, %v992_v32 }
 0x4f2   :  { %v491_v3 = vsub.f32 %v1238_v27, %v490_v1 }
 0x4f3   :  { %v605_v41 = vadd.f32 1e-06, %v493_v2 }
 0x4f4   :  { %v616_v5 = vrot.slane %v491_v3, 4 }
 0x4f5   :  { %v606_v4 = vrot.slane %v605_v41, 4 }
 0x4f6   :  { %v617_v8 = vadd.f32 %v616_v5, %v491_v3 }
 0x4f7   :  { %v607_v6 = vadd.f32 %v606_v4, %v605_v41 }
 0x4f8   :  { %v618_v11 = vrot.slane %v617_v8, 2 }
 0x4f9   :  { %v608_v7 = vrot.slane %v607_v6, 2 }
 0x4fa   :  { %v619_v14 = vadd.f32 %v618_v11, %v617_v8 }
 0x4fb   :  { %v609_v9 = vadd.f32 %v608_v7, %v607_v6 }
 0x4fc   :  { %v620_v15 = vrot.slane %v619_v14, 1 }
 0x4fd   :  { %v610_v10 = vrot.slane %v609_v9, 1 }
 0x4fe   :  { %v621_v16 = vadd.f32 %v620_v15, %v619_v14 }
 0x4ff   :  { %v611_v12 = vadd.f32 %v610_v10, %v609_v9 }
 0x500   :  { %v623_v19 = vmul.f32 0.125, %v621_v16 }
 0x501   :  { %v613_v13 = vmul.f32 0.125, %v611_v12 }
 0x503   :  { %997 = vlog2.f32 %v613_v13  ;;  %v638_v0 = vsub.f32 0.0, %v613_v13 }
 0x50d   :  { %v998_v17 = vpop.eup %997 }
 0x50e   :  { %v615_v18 = vmul.f32 0.6931472, %v998_v17 }
 0x510   :  { %v639_v20 = vmul.f32 %v638_v0, %v615_v18  ;;  %v624_v21 = vsub.f32 %v615_v18, %v623_v19 }
 0x512   :  { %v640_v22 = vsel %vm622_vm3, %v639_v20, 0.0  ;;  %v625_v23 = vmul.f32 %v624_v21, %v613_v13 }
 0x513   :  { %v641_v27 = vsel %vm627_vm4, %v640_v22, 0.0 }
 0x514   :  { %642 = vadd.xlane.f32.xlu0 %v641_v27  ;;  %v626_v29 = vsel %vm622_vm3, %v625_v23, 0.0 }
 0x515   :  { %v628_v30 = vsel %vm627_vm4, %v626_v29, 0.0 }
 0x516   :  { %629 = vadd.xlane.f32.xlu1 %v628_v30 }
 0x56d   :  { %v510_v28 = vpop.xlane.xlu1 %509 }
 0x56e   :  { %v511_v32 = vcvt.f32.s32 %v510_v28 }
 0x570   :  { %v514_v33 = vadd.s32 %v513_v31, %v511_v32 }
 0x572   :  { %vm515_vm5 = vcmp.eq.s32.totalorder %v1236_v24, %v514_v33 }
 0x573   :  { %900 = vmatmul.mubr.msk.f32.vlgmr.msra.gmra.mrb[8].mxu0 %vm515_vm5, %v1115_v34 }
 0x5a1   :  { %v643_v35 = vpop.xlane.xlu0 %642 }
 0x5a2   :  { %v644_v36 = vrot.slane %v643_v35, 4 }
 0x5a3   :  { %v630_v25 = vpop.xlane.xlu1 %629 }
 0x5a4   :  { %v645_v37 = vadd.f32 %v644_v36, %v643_v35  ;;  %v631_v38 = vrot.slane %v630_v25, 4 }
 0x5a6   :  { %v646_v39 = vrot.slane %v645_v37, 2  ;;  %v632_v40 = vadd.f32 %v631_v38, %v630_v25 }
 0x5a8   :  { %v647_v42 = vadd.f32 %v646_v39, %v645_v37  ;;  %v633_v43 = vrot.slane %v632_v40, 2 }
 0x5aa   :  { %v634_v44 = vadd.f32 %v633_v43, %v632_v40  ;;  %v648_v45 = vrot.slane %v647_v42, 1 }
 0x5ac   :  { %v635_v46 = vrot.slane %v634_v44, 1  ;;  %v649_v48 = vadd.f32 %v648_v45, %v647_v42 }
 0x5ae   :  { %v636_v47 = vadd.f32 %v635_v46, %v634_v44 }
 0x5b0   :  { %950 = vpush %v636_v47 }
 0x5b1   :  { %952 = vpush %v649_v48 }
 0x5e1   :  { %s951_s2 = spop %950 }
 0x5e2   :  { %s651_s27 = smul.f32 0.01, %s951_s2  ;;  %s953_s28 = spop %952 }
 0x5e3   :  { %s652_s29 = smul.f32 0.01, %s953_s28 }
 0x5e5   :  { %s653_s30 = sadd.f32 %s652_s29, %s651_s27 }
 0x5e7   :  { %655 = sst [smem:[#allocation10]] %s653_s30 }
 0x5e8   :  { %1074 = shalt.err (!%p1071_p12)
}
 0x5e9   :  { %s1116_s12 = smov [#allocation10]   ;;  %s1117_s14 = smov [#allocation9]  }
 0x5ea   :  { %673 = dma.smem_to_hbm %s1116_s12, 16, %s1280_s4, [#allocation5]  }
 0x5eb   :  { %s662_s15 = sshll.u32 %s1117_s14, 4  ;;  %s663_s15 = int_to_ptr.vmem [resolvable:$true] %s662_s15 }
 0x5ec   :  { %s1075_s16 = scalar_lea.vmem %s663_s15, 128  ;;  %p1080_p0 = scmp.lt.s32.totalorder %s663_s15, %s663_s15 }
 0x5ed   :  { %p1076_p13 = scmp.ne.s32.totalorder %s663_s15, %s1075_s16  ;;  %p1081_p1 = scmp.lt.s32.totalorder %s1075_s16, %s1075_s16 }
 0x5ef   :  { %p1082_p2 = por %p1081_p1, %p1080_p0 }
 0x5f1   :  { %p1083_p3 = pnand %p1082_p2, %p1076_p13 }
 0x646   :  { %v600_v24 = vpop.f32.mrb[8].mxu0 }
 0x647   :  { %604 = vst [vmem:[#allocation9] sm:$0xff] %v600_v24  ;;  %v901_v49 = vpop.f32.mrb[9].mxu0 }
 0x648   :  { %1086 = shalt.err (!%p1083_p3)
}
 0x649   :  { %s1087_s19 = scalar_lea.hbm %s1279_s3, 128 }
 0x64a   :  { %p1088_p4 = scmp.ne.s32.totalorder %s1279_s3, %s1087_s19  ;;  %p1091_p5 = scmp.lt.u32.totalorder %s1087_s19, %s1279_s3 }
 0x64c   :  { %p1093_p6 = pnand %p1091_p5, %p1088_p4 }
 0x64e   :  { %1096 = shalt.err (!%p1093_p6)
}
 0x64f   :  { %665 = dma.vmem_to_hbm [thread:$0]  %s663_s15, 128, %s1279_s3, [#allocation4]  }
 0x650   :  { %1101 = dma.done.wait [#allocation4], 128  }
 0x651   :  { %1102 = vsyncadd [#allocation4], 4294967168 }
 0x652   :  { %1103 = dma.done.wait [#allocation5], 16  }
 0x653   :  { %1104 = vsyncadd [#allocation5], 4294967280 }
 0x654   :  { %680 = sfence }
 0x655   :  { %681 = vsyncpa [#allocation3], 1 }
 0x656   :  { %682 = vsyncpa [#allocation7], 1 }
 0x657   :  { %683 = vsyncpa [#allocation4], 1 }
 0x658   :  { %684 = vsyncpa [#allocation5], 1 }

</bundles_post_ra>
